<compile_context>
chip_gen: v5e
topology: v5e:2x2
jax: 0.10.0
libtpu: 0.0.40
codegen_flags: <defaults>
</compile_context>

<pallas_src>
import jax
import jax.numpy as jnp
from jax.experimental import pallas as pl
from jax.experimental.pallas import tpu as pltpu


# ----------------------------------------------------------------------------
# Pallas kernel: out[r, :] = emb[r, :] * mask[r, 0]
# ----------------------------------------------------------------------------
def _mask_embed_kernel(emb_ref, mask_ref, out_ref):
    # mask_ref is (rows, 1): lane-broadcast multiply on the VPU.
    out_ref[...] = emb_ref[...] * mask_ref[...]


def _row_tile(rows, d, itemsize):
    """Pick a row tile: large (~2 MiB per block) but a multiple of 8 sublanes,
    or the full row count for small arrays.  Keeps double-buffered VMEM use
    well under the v7x 32 MiB scoped default while still giving the pipeline
    big rectangular DMAs on v5e/v6e."""
    target_rows = max(8, (2 * 1024 * 1024) // max(1, d * itemsize))
    tr = min(rows, target_rows, 1024)
    tr = (tr // 8) * 8
    if tr < 8 or tr >= rows:
        return rows  # single full block (always a legal block shape)
    return tr


def apply_condition_mask(embedding, new_mask):
    """embedding: [B, T, D]; new_mask: [B, T] (bool/float) -> embedding * new_mask[..., None]."""
    B, T, D = embedding.shape
    R = B * T
    emb2 = embedding.reshape(R, D)
    mask2 = new_mask.reshape(R, 1).astype(embedding.dtype)

    tr = _row_tile(R, D, embedding.dtype.itemsize)
    grid = (pl.cdiv(R, tr),)

    out = pl.pallas_call(
        _mask_embed_kernel,
        out_shape=jax.ShapeDtypeStruct((R, D), embedding.dtype),
        grid=grid,
        in_specs=[
            pl.BlockSpec((tr, D), lambda i: (i, 0)),
            pl.BlockSpec((tr, 1), lambda i: (i, 0)),
        ],
        out_specs=pl.BlockSpec((tr, D), lambda i: (i, 0)),
        compiler_params=pltpu.CompilerParams(
            dimension_semantics=("parallel",),          # row tiles are independent (megacore on v7x)
            vmem_limit_bytes=32 * 1024 * 1024,          # explicit; safe on v5e/v6e/v7x
        ),
    )(emb2, mask2)
    return out.reshape(B, T, D)


# ----------------------------------------------------------------------------
# Module (JAX / Pallas)
# ----------------------------------------------------------------------------
def prob_mask_like(key, shape, prob):
    if prob == 1:
        return jnp.ones(shape, dtype=bool)
    elif prob == 0:
        return jnp.zeros(shape, dtype=bool)
    else:
        return jax.random.uniform(key, shape) < prob


class ClassifierFreeGuidanceDropout:
    """Classifier-free-guidance dropout: all attributes dropped with the same
    per-batch probability.  Mirrors the PyTorch module's forward semantics."""

    def __init__(self, p: float = 0.0, seed: int = 42):
        self.p = p
        self.seed = seed
        self._base_key = jax.random.PRNGKey(seed)
        self.training = True  # nn.Module default

    def train(self):
        self.training = True
        return self

    def eval(self):
        self.training = False
        return self

    def forward(self, conditions, drop_prob=None, keep_len=False, rng_key=None):
        drop_prob = drop_prob if drop_prob is not None else self.p
        key = rng_key if rng_key is not None else self._base_key
        # JAX arrays are immutable, so a shallow dict copy matches torch's clone()-copy.
        conditions_ = dict(conditions)
        for idx, (modality, (embedding, mask)) in enumerate(conditions.items()):
            b, n = mask.shape
            mask_b = mask.astype(bool)
            if drop_prob == 1.0:
                # prob_mask_like((b,1), 1 - drop_prob) == all-False -> everything dropped.
                new_mask = jnp.zeros((b, n), dtype=bool)
                if not keep_len:
                    embedding = embedding[:, :1, :]
                    new_mask = new_mask[:, :1]
                new_embedding = apply_condition_mask(embedding, new_mask)  # Pallas hot path
                conditions_[modality] = (new_embedding, new_mask)
            elif drop_prob > 0.0 and (not self.training):
                sub = jax.random.fold_in(key, idx)
                drop_mask = prob_mask_like(sub, (b, 1), 1.0 - drop_prob)
                new_mask = jnp.logical_and(mask_b, drop_mask)
                new_embedding = apply_condition_mask(embedding, new_mask)  # Pallas hot path
                conditions_[modality] = (new_embedding, new_mask)
        return conditions_

    __call__ = forward

    def __repr__(self):
        return f"ClassifierFreeGuidanceDropout(p={self.p})"


# ----------------------------------------------------------------------------
# Pure-JAX reference (for verification)
# ----------------------------------------------------------------------------
def reference_forward(conditions, drop_prob, training, keep_len, key):
    out = dict(conditions)
    for idx, (modality, (embedding, mask)) in enumerate(conditions.items()):
        b, n = mask.shape
        mask_b = mask.astype(bool)
        if drop_prob == 1.0:
            new_mask = jnp.zeros((b, n), dtype=bool)
            new_embedding = embedding * new_mask[..., None].astype(embedding.dtype)
            if not keep_len:
                new_embedding = new_embedding[:, :1, :]
                new_mask = new_mask[:, :1]
            out[modality] = (new_embedding, new_mask)
        elif drop_prob > 0.0 and not training:
            sub = jax.random.fold_in(key, idx)
            drop_mask = jax.random.uniform(sub, (b, 1)) < (1.0 - drop_prob)
            new_mask = jnp.logical_and(mask_b, drop_mask)
            new_embedding = embedding * new_mask[..., None].astype(embedding.dtype)
            out[modality] = (new_embedding, new_mask)
    return out


if __name__ == "__main__":
    key = jax.random.PRNGKey(0)
    B = 2
    k0, k1, k2, k3 = jax.random.split(key, 4)

    # Two condition modalities: "text" [B, 8, 32], "audio" [B, 6, 128].
    text = jax.random.normal(k0, (B, 8, 32), jnp.float32)
    text_mask = (jax.random.uniform(k1, (B, 8)) > 0.2).astype(jnp.float32)
    audio = jax.random.normal(k2, (B, 6, 128), jnp.float32)
    audio_mask = jnp.ones((B, 6), jnp.float32)

    conditions = {"text": (text, text_mask), "audio": (audio, audio_mask)}

    cfg = ClassifierFreeGuidanceDropout(p=0.5, seed=42).eval()
    rng = jax.random.PRNGKey(42)

    # Case 1: 0 < p < 1 in eval mode -> stochastic per-batch dropout.
    out1 = cfg(conditions, rng_key=rng)
    ref1 = reference_forward(conditions, 0.5, training=False, keep_len=False, key=rng)

    # Case 2: drop_prob == 1.0, keep_len=False -> everything dropped, truncated to 1 timestep.
    out2 = cfg(conditions, drop_prob=1.0, keep_len=False, rng_key=rng)
    ref2 = reference_forward(conditions, 1.0, training=False, keep_len=False, key=rng)

    # Case 3: drop_prob == 1.0, keep_len=True -> everything dropped, full length kept.
    out3 = cfg(conditions, drop_prob=1.0, keep_len=True, rng_key=rng)
    ref3 = reference_forward(conditions, 1.0, training=False, keep_len=True, key=rng)

    jax.block_until_ready((out1, out2, out3))

    for out, ref in ((out1, ref1), (out2, ref2), (out3, ref3)):
        for modality in out:
            oe, om = out[modality]
            re_, rm = ref[modality]
            assert oe.shape == re_.shape, f"{modality}: embedding shape mismatch"
            assert om.shape == rm.shape, f"{modality}: mask shape mismatch"
            assert jnp.allclose(oe, re_, atol=1e-6), f"{modality}: embedding mismatch"
            assert jnp.array_equal(om, rm), f"{modality}: mask mismatch"

    print("KERNEL_OK")
</pallas_src>

<mosaic_0001>
module attributes {stable_mosaic.version = 11 : i64} {
  func.func @_mask_embed_kernel(%arg0: i32, %arg1: memref<16x32xf32, #tpu.memory_space<vmem>>, %arg2: memref<16x1xf32, #tpu.memory_space<vmem>>, %arg3: memref<16x32xf32, #tpu.memory_space<vmem>>) attributes {dimension_semantics = [#tpu.dimension_semantics<parallel>], iteration_bounds = array<i64: 1>, scalar_prefetch = 0 : i64, scratch_operands = 0 : i64, tpu.core_type = #tpu.core_type<tc>, window_params = [{transform_indices = @transform_0, window_bounds = array<i64: 16, 32>}, {transform_indices = @transform_1, window_bounds = array<i64: 16, 1>}, {transform_indices = @transform_2, window_bounds = array<i64: 16, 32>}]} {
    %c0 = arith.constant 0 : index
    %c0_0 = arith.constant 0 : index
    %0 = vector.load %arg1[%c0, %c0_0] : memref<16x32xf32, #tpu.memory_space<vmem>>, vector<16x32xf32>
    %c0_1 = arith.constant 0 : index
    %c0_2 = arith.constant 0 : index
    %1 = vector.load %arg2[%c0_1, %c0_2] : memref<16x1xf32, #tpu.memory_space<vmem>>, vector<16x1xf32>
    %2 = vector.broadcast %1 : vector<16x1xf32> to vector<16x32xf32>
    %3 = arith.mulf %0, %2 : vector<16x32xf32>
    %c0_3 = arith.constant 0 : index
    %c0_4 = arith.constant 0 : index
    %4 = vector.load %arg3[%c0_3, %c0_4] : memref<16x32xf32, #tpu.memory_space<vmem>>, vector<16x32xf32>
    tpu.vector_store %arg3[%c0_3, %c0_4], %3 {strides = array<i32>} : memref<16x32xf32, #tpu.memory_space<vmem>>, vector<16x32xf32>,
    return
  }
  func.func @transform_0(%arg0: i32) -> (i32, i32) {
    %c0_i32 = arith.constant 0 : i32
    %c0_i32_0 = arith.constant 0 : i32
    return %arg0, %c0_i32 : i32, i32
  }
  func.func @transform_1(%arg0: i32) -> (i32, i32) {
    %c0_i32 = arith.constant 0 : i32
    %c0_i32_0 = arith.constant 0 : i32
    return %arg0, %c0_i32 : i32, i32
  }
  func.func @transform_2(%arg0: i32) -> (i32, i32) {
    %c0_i32 = arith.constant 0 : i32
    %c0_i32_0 = arith.constant 0 : i32
    return %arg0, %c0_i32 : i32, i32
  }
}

</mosaic_0001>

<bundles_post_ra>
// kernel: tpu_custom_call.1
= control target key start
LH: loop header
LB: loop body
LE: loop exit
PB: predicated region body
PF: predicated region fallthrough
CT: control target
= control target key end

     0   :  { %s114_s0 = inlined_call_operand.vmem [shape: f32[16,32], index: 0, kind: input, shape index: {}]   ;;  %s115_s1 = inlined_call_operand.vmem [shape: f32[16,1], index: 1, kind: input, shape index: {}]   ;;  %s116_s2 = inlined_call_operand.hbm [shape: f32[16,32], index: 2, kind: output, shape index: {}]  }
   0x1   :  { %v14_v0 = vld [vmem:[%s115_s1] sm:$0xff] }
   0x2   :  { %7 = vsyncpa [#allocation3], 0  ;;  %v80_v1 = vmov 0   ;;  %v15_v2 = vld [vmem:[%s115_s1 + $0x8] sm:$0xff]  ;;  %v12_v3 = vld [vmem:[%s114_s0] sm:$0xff]  ;;  %vm28_vm0 = vcmask 261120  }
   0x3   :  { %53 = vset.pattern.permute.xlu0 %v80_v1  ;;  %s81_s15 = smov [#allocation2]   ;;  %s37_s19 = sshll.u32 %s116_s2, 4  ;;  %v13_v6 = vld [vmem:[%s114_s0 + $0x8] sm:$0xff]  ;;  %s38_s19 = int_to_ptr.hbm [resolvable:$true] %s37_s19 }
   0x4   :  { %18 = vperm.xlu0 %53, %v14_v0   ;;  %s35_s16 = sshll.u32 %s81_s15, 4  ;;  %s82_s1 = smov 128   ;;  %s36_s16 = int_to_ptr.vmem [resolvable:$true] %s35_s16 }
   0x5   :  { %s83_s22 = smov 8  }
   0xc   :  { %23 = vperm.xlu0 %53, %v15_v2  }
  0x76   :  { %v19_v4 = vpop.permute.xlu0 %18 }
  0x77   :  { %v26_v5 = vmul.f32 %v19_v4, %v12_v3 }
  0x79   :  { %29 = vst.msk [vmem:[#allocation2] sm:$0xff] %vm28_vm0, %v26_v5 }
  0x7e   :  { %v24_v7 = vpop.permute.xlu0 %23 }
  0x7f   :  { %v27_v8 = vmul.f32 %v24_v7, %v13_v6 }
  0x81   :  { %30 = vst.msk [vmem:[#allocation2 + $0x8] sm:$0xff] %vm28_vm0, %v27_v8 }
  0x82   :  { %43 = dma.vmem_to_hbm [thread:$0]  %s36_s16, 256, %s38_s19, [#allocation3], %s82_s1, %s82_s1, %s83_s22  }
  0x83   :  { %78 = dma.done.wait [#allocation3], 256  }
  0x84   :  { %79 = vsyncadd [#allocation3], 4294967040 }
  0x85   :  { %48 = vsyncpa [#allocation3], 1 }

</bundles_post_ra>
